<compile_context>
chip_gen: v5e
topology: v5e:2x2
jax: 0.10.0
libtpu: 0.0.40
codegen_flags: <defaults>
</compile_context>

<pallas_src>
import math

import jax
import jax.numpy as jnp
from jax.experimental import pallas as pl
from jax.experimental.pallas import tpu as pltpu


# ---------------------------------------------------------------------------
# Kernels
# ---------------------------------------------------------------------------
def nmlp_kernel_inplace(x_ref, w1_ref, w2_ref, o_ref):
    # f32 output: o_ref's block index is constant over k -> resident across
    # the hidden axis, so use it directly as the accumulator (no scratch).
    #   x_ref:  (tm, dim) bf16     w1_ref: (dim, th) bf16 (S_u folded in)
    #   w2_ref: (th, dim) bf16 (S_m*scaler folded in)
    #   o_ref:  (tm, dim) f32
    @pl.when(pl.program_id(1) == 0)
    def _init():
        o_ref[...] = jnp.zeros_like(o_ref)

    h = jnp.dot(x_ref[...], w1_ref[...], preferred_element_type=jnp.float32)
    h = jnp.maximum(h, 0.0)
    h = h * h
    o_ref[...] += jnp.dot(h.astype(w2_ref.dtype), w2_ref[...],
                          preferred_element_type=jnp.float32)


def nmlp_kernel_scratch(x_ref, w1_ref, w2_ref, o_ref, acc_ref):
    # Non-f32 output: accumulate in an f32 VMEM scratch, cast at the last k.
    k = pl.program_id(1)

    @pl.when(k == 0)
    def _init():
        acc_ref[...] = jnp.zeros_like(acc_ref)

    h = jnp.dot(x_ref[...], w1_ref[...], preferred_element_type=jnp.float32)
    h = jnp.maximum(h, 0.0)
    h = h * h
    acc_ref[...] += jnp.dot(h.astype(w2_ref.dtype), w2_ref[...],
                            preferred_element_type=jnp.float32)

    @pl.when(k == pl.num_programs(1) - 1)
    def _finalize():
        o_ref[...] = acc_ref[...].astype(o_ref.dtype)


# ---------------------------------------------------------------------------
# Tile selection (VMEM-budget aware)
# ---------------------------------------------------------------------------
_ROW_TILE_CANDIDATES = (1024, 768, 512, 384, 256, 128, 64, 32, 16, 8)
_HID_TILE_CANDIDATES = (2048, 1024, 512, 256, 128)


def _round_up(x, m):
    return ((x + m - 1) // m) * m


def _vmem_capacity_bytes():
    try:
        info = pltpu.get_tpu_info()
        cap = getattr(info, "vmem_capacity_bytes", None)
        if cap:
            return int(cap)
    except Exception:
        pass
    return 64 * 1024 * 1024  # conservative fallback (v7x per-TC VMEM)


def _vmem_estimate_bytes(tm, th, dim, out_itemsize, use_scratch):
    bf16, f32 = 2, 4
    est = (2 * tm * dim * bf16          # x tile, double-buffered
           + 2 * tm * dim * out_itemsize  # out tile, double-buffered
           + 2 * dim * th * bf16        # W_fc^T chunk, double-buffered
           + 2 * th * dim * bf16        # W_proj^T chunk, double-buffered
           + tm * th * f32)             # h chunk temporary
    if use_scratch:
        est += tm * dim * f32           # f32 accumulator scratch
    return est


def _select_tiles(M, dim, hdim, out_itemsize, vmem_budget, use_scratch):
    """Largest tm (weight reuse) first; shrink th before tm."""
    m8 = _round_up(M, 8)
    tm_cands = sorted({t for t in _ROW_TILE_CANDIDATES if t <= m8}
                      | {min(m8, 1024)}, reverse=True)
    th_cands = [t for t in _HID_TILE_CANDIDATES if t <= hdim and hdim % t == 0]
    if not th_cands:
        th_cands = [hdim]  # small / irregular hidden dim: take it whole
    for tm in tm_cands:
        for th in th_cands:
            if _vmem_estimate_bytes(tm, th, dim, out_itemsize,
                                    use_scratch) <= vmem_budget:
                return tm, th
    # Nothing fits the budget comfortably: smallest tiles (compiler may spill).
    return tm_cands[-1], th_cands[-1]


# ---------------------------------------------------------------------------
# Host wrapper
# ---------------------------------------------------------------------------
def nmlp_forward(x, w1, s_u, w2, s_m, scaler):
    """x: (..., dim); w1 = W_fc^T: (dim, hdim); w2 = W_proj^T: (hdim, dim)."""
    orig_shape = x.shape
    out_dtype = x.dtype
    dim = orig_shape[-1]
    hdim = w1.shape[1]
    M = math.prod(orig_shape[:-1])
    out_itemsize = jnp.dtype(out_dtype).itemsize
    acc_in_out = jnp.dtype(out_dtype) == jnp.dtype(jnp.float32)
    use_scratch = not acc_in_out

    cap = _vmem_capacity_bytes()
    tile_budget = int(cap * 0.75)  # headroom for Mosaic internal scratch
    tm, th = _select_tiles(M, dim, hdim, out_itemsize, tile_budget, use_scratch)

    grid_m = pl.cdiv(M, tm)
    M_pad = grid_m * tm
    grid_k = hdim // th

    # Fold scales into the weights in f32 (exact: per-column scaling commutes
    # with relu), then cast the matmul operands to bf16.
    w1f = (w1.astype(jnp.float32)
           * s_u.astype(jnp.float32)[None, :]).astype(jnp.bfloat16)
    w2f = (w2.astype(jnp.float32)
           * (s_m.astype(jnp.float32) * jnp.float32(scaler))[None, :]
           ).astype(jnp.bfloat16)

    x2 = x.reshape(M, dim)
    if M_pad != M:
        x2 = jnp.pad(x2, ((0, M_pad - M), (0, 0)))
    x2 = x2.astype(jnp.bfloat16)

    # Accurate HBM-traffic hint: weights are re-streamed once per row tile.
    flops = 2 * M_pad * dim * hdim * 2
    bytes_accessed = (x2.size * 2 + M_pad * dim * out_itemsize
                      + grid_m * (w1f.size + w2f.size) * 2)
    cost = pl.CostEstimate(flops=flops, transcendentals=0,
                           bytes_accessed=bytes_accessed)

    est = _vmem_estimate_bytes(tm, th, dim, out_itemsize, use_scratch)
    vmem_limit = int(min(max(est + (8 << 20), 32 << 20), int(cap * 0.85)))

    kernel = nmlp_kernel_scratch if use_scratch else nmlp_kernel_inplace
    scratch = ([pltpu.VMEM((tm, dim), jnp.float32)] if use_scratch else [])

    out = pl.pallas_call(
        kernel,
        out_shape=jax.ShapeDtypeStruct((M_pad, dim), out_dtype),
        grid_spec=pltpu.PrefetchScalarGridSpec(
            num_scalar_prefetch=0,
            grid=(grid_m, grid_k),
            in_specs=[
                pl.BlockSpec((tm, dim), lambda i, k: (i, 0)),   # x row tile
                pl.BlockSpec((dim, th), lambda i, k: (0, k)),   # W_fc^T chunk
                pl.BlockSpec((th, dim), lambda i, k: (k, 0)),   # W_proj^T chunk
            ],
            out_specs=pl.BlockSpec((tm, dim), lambda i, k: (i, 0)),
            scratch_shapes=scratch,
        ),
        compiler_params=pltpu.CompilerParams(
            dimension_semantics=("parallel", "arbitrary"),
            vmem_limit_bytes=vmem_limit),
        cost_estimate=cost,
    )(x2, w1f, w2f)

    if M_pad != M:
        out = out[:M]
    return out.reshape(orig_shape)


def nmlp_reference(x, w1, s_u, w2, s_m, scaler):
    h = jnp.einsum("btd,dh->bth", x, w1) * s_u
    h = jnp.maximum(h, 0.0) ** 2
    return jnp.einsum("bth,hd->btd", h, w2) * s_m * scaler


if __name__ == "__main__":
    B, T, dim = 2, 8, 32
    hdim = 4 * dim  # 128

    key = jax.random.PRNGKey(0)
    k_x, k_fc, k_proj, k_su, k_sm = jax.random.split(key, 5)

    x = jax.random.normal(k_x, (B, T, dim), dtype=jnp.float32)

    # c_fc: nn.Linear(dim, hdim) weight (hdim, dim), uniform(+-1/sqrt(dim)),
    # then column-normalized as in __init__ (norm over dim=0, per input col).
    bound = 1.0 / math.sqrt(dim)
    w_fc = jax.random.uniform(k_fc, (hdim, dim), jnp.float32, -bound, bound)
    eps = jnp.finfo(jnp.float32).eps
    w_fc = w_fc / (jnp.linalg.norm(w_fc, axis=0, keepdims=True) + eps)
    w1 = w_fc.T  # (dim, hdim)

    # c_proj: nn.Linear(hdim, dim) weight (dim, hdim).  The module zeroes it;
    # here we use small deterministic values so the kernel path is exercised.
    w_proj = 0.02 * jax.random.normal(k_proj, (dim, hdim), dtype=jnp.float32)
    w2 = w_proj.T  # (hdim, dim)

    # Undefined-in-__init__ nGPT scales (see TODO above): deterministic values.
    s_u = 1.0 + 0.1 * jax.random.normal(k_su, (hdim,), dtype=jnp.float32)
    s_m = 1.0 + 0.1 * jax.random.normal(k_sm, (dim,), dtype=jnp.float32)
    scaler = float(math.sqrt(dim))

    out = nmlp_forward(x, w1, s_u, w2, s_m, scaler)
    out = jax.block_until_ready(out)

    ref = nmlp_reference(x, w1, s_u, w2, s_m, scaler)
    assert out.shape == (B, T, dim)
    # Matmul operands are bf16 (scales folded pre-cast), so tolerance is bf16-level.
    assert jnp.allclose(out, ref, atol=5e-2, rtol=5e-2), (
        float(jnp.max(jnp.abs(out - ref))))

    print("KERNEL_OK")
</pallas_src>

<mosaic_0001>
module attributes {stable_mosaic.version = 11 : i64} {
  func.func @nmlp_kernel_inplace(%arg0: i32, %arg1: i32, %arg2: memref<16x32xbf16, #tpu.memory_space<vmem>>, %arg3: memref<32x128xbf16, #tpu.memory_space<vmem>>, %arg4: memref<128x32xbf16, #tpu.memory_space<vmem>>, %arg5: memref<16x32xf32, #tpu.memory_space<vmem>>) attributes {dimension_semantics = [#tpu.dimension_semantics<parallel>, #tpu.dimension_semantics<arbitrary>], iteration_bounds = array<i64: 1, 1>, scalar_prefetch = 0 : i64, scratch_operands = 0 : i64, tpu.core_type = #tpu.core_type<tc>, window_params = [{transform_indices = @transform_0, window_bounds = array<i64: 16, 32>}, {transform_indices = @transform_1, window_bounds = array<i64: 32, 128>}, {transform_indices = @transform_2, window_bounds = array<i64: 128, 32>}, {transform_indices = @transform_3, window_bounds = array<i64: 16, 32>}]} {
    %c0_i32 = arith.constant 0 : i32
    %0 = arith.cmpi eq, %arg1, %c0_i32 : i32
    %1 = arith.extui %0 : i1 to i32
    %c0_i32_0 = arith.constant 0 : i32
    %2 = arith.cmpi ne, %1, %c0_i32_0 : i32
    scf.if %2 {
      %cst_12 = arith.constant 0.000000e+00 : f32
      %15 = vector.broadcast %cst_12 : f32 to vector<16x32xf32>
      %c0_13 = arith.constant 0 : index
      %c0_14 = arith.constant 0 : index
      %16 = vector.load %arg5[%c0_13, %c0_14] : memref<16x32xf32, #tpu.memory_space<vmem>>, vector<16x32xf32>
      tpu.vector_store %arg5[%c0_13, %c0_14], %15 {strides = array<i32>} : memref<16x32xf32, #tpu.memory_space<vmem>>, vector<16x32xf32>,
    } else {
    }
    %c0 = arith.constant 0 : index
    %c0_1 = arith.constant 0 : index
    %3 = vector.load %arg2[%c0, %c0_1] : memref<16x32xbf16, #tpu.memory_space<vmem>>, vector<16x32xbf16>
    %c0_2 = arith.constant 0 : index
    %c0_3 = arith.constant 0 : index
    %4 = vector.load %arg3[%c0_2, %c0_3] : memref<32x128xbf16, #tpu.memory_space<vmem>>, vector<32x128xbf16>
    %cst = arith.constant dense<0.000000e+00> : vector<16x128xf32>
    %5 = tpu.matmul %3, %4, %cst {dimension_numbers = #tpu.dot_dimension_numbers<[1], [0], [0], [1], [0, 0, 1, 1], [], []>} : vector<16x32xbf16>, vector<32x128xbf16>, vector<16x128xf32> -> vector<16x128xf32>
    %cst_4 = arith.constant 0.000000e+00 : f32
    %6 = vector.broadcast %cst_4 : f32 to vector<16x128xf32>
    %7 = arith.maximumf %5, %6 : vector<16x128xf32>
    %8 = arith.mulf %7, %7 : vector<16x128xf32>
    %c0_5 = arith.constant 0 : index
    %c0_6 = arith.constant 0 : index
    %9 = vector.load %arg5[%c0_5, %c0_6] : memref<16x32xf32, #tpu.memory_space<vmem>>, vector<16x32xf32>
    %10 = arith.truncf %8 : vector<16x128xf32> to vector<16x128xbf16>
    %c0_7 = arith.constant 0 : index
    %c0_8 = arith.constant 0 : index
    %11 = vector.load %arg4[%c0_7, %c0_8] : memref<128x32xbf16, #tpu.memory_space<vmem>>, vector<128x32xbf16>
    %cst_9 = arith.constant dense<0.000000e+00> : vector<16x32xf32>
    %12 = tpu.matmul %10, %11, %cst_9 {dimension_numbers = #tpu.dot_dimension_numbers<[1], [0], [0], [1], [0, 0, 1, 1], [], []>} : vector<16x128xbf16>, vector<128x32xbf16>, vector<16x32xf32> -> vector<16x32xf32>
    %13 = arith.addf %9, %12 : vector<16x32xf32>
    %c0_10 = arith.constant 0 : index
    %c0_11 = arith.constant 0 : index
    %14 = vector.load %arg5[%c0_10, %c0_11] : memref<16x32xf32, #tpu.memory_space<vmem>>, vector<16x32xf32>
    tpu.vector_store %arg5[%c0_10, %c0_11], %13 {strides = array<i32>} : memref<16x32xf32, #tpu.memory_space<vmem>>, vector<16x32xf32>,
    return
  }
  func.func @transform_0(%arg0: i32, %arg1: i32) -> (i32, i32) {
    %c0_i32 = arith.constant 0 : i32
    %c0_i32_0 = arith.constant 0 : i32
    return %arg0, %c0_i32 : i32, i32
  }
  func.func @transform_1(%arg0: i32, %arg1: i32) -> (i32, i32) {
    %c0_i32 = arith.constant 0 : i32
    %c0_i32_0 = arith.constant 0 : i32
    return %c0_i32, %arg1 : i32, i32
  }
  func.func @transform_2(%arg0: i32, %arg1: i32) -> (i32, i32) {
    %c0_i32 = arith.constant 0 : i32
    %c0_i32_0 = arith.constant 0 : i32
    return %arg1, %c0_i32 : i32, i32
  }
  func.func @transform_3(%arg0: i32, %arg1: i32) -> (i32, i32) {
    %c0_i32 = arith.constant 0 : i32
    %c0_i32_0 = arith.constant 0 : i32
    return %arg0, %c0_i32 : i32, i32
  }
}

</mosaic_0001>

<bundles_post_ra>
// kernel: tpu_custom_call.1
= control target key start
LH: loop header
LB: loop body
LE: loop exit
PB: predicated region body
PF: predicated region fallthrough
CT: control target
= control target key end

     0   :  { %s322_s0 = inlined_call_operand.vmem [shape: bf16[16,32], index: 0, kind: input, shape index: {}]   ;;  %s323_s1 = inlined_call_operand.vmem [shape: bf16[32,128], index: 1, kind: input, shape index: {}]   ;;  %s324_s2 = inlined_call_operand.vmem [shape: bf16[128,32], index: 2, kind: input, shape index: {}]   ;;  %s325_s3 = inlined_call_operand.hbm [shape: f32[16,32], index: 3, kind: output, shape index: {}]  }
   0x1   :  { %v218_v0 = vld [vmem:[%s323_s1 + $0x8] sm:$0xff]  ;;  %v226_v1 = vld [vmem:[%s324_s2 + $0x38] sm:$0xff]  ;;  %v217_v2 = vld [vmem:[%s323_s1] sm:$0xff] }
   0x2   :  { %56 = vmatpush.bf16.msra.mxu0 %v218_v0 }
   0x3   :  { %8 = vsyncpa [#allocation3], 0  ;;  %135 = vmatpush.bf16.msra.mxu1 %v226_v1  ;;  %v225_v3 = vld [vmem:[%s324_s2 + $0x30] sm:$0xff]  ;;  %v216_v4 = vld [vmem:[%s322_s0] sm:$0xff]  ;;  %vm20_vm0 = vcmask 261120   ;;  %v257_v11 = vmov 0.0  }
   0x4   :  { %v224_v5 = vld [vmem:[%s324_s2 + $0x28] sm:$0xff]  ;;  %v223_v6 = vld [vmem:[%s324_s2 + $0x20] sm:$0xff]  ;;  %v222_v7 = vld [vmem:[%s324_s2 + $0x18] sm:$0xff]  ;;  %21 = vst.msk [vmem:[#allocation2] sm:$0xff] %vm20_vm0, %v257_v11  ;;  %s159_s8 = sshll.u32 %s325_s3, 4  ;;  %s259_s9 = smov 128   ;;  %s160_s8 = int_to_ptr.hbm [resolvable:$true] %s159_s8 }
   0x5   :  { %v221_v8 = vld [vmem:[%s324_s2 + $0x10] sm:$0xff]  ;;  %v220_v9 = vld [vmem:[%s324_s2 + $0x8] sm:$0xff]  ;;  %v219_v10 = vld [vmem:[%s324_s2] sm:$0xff]  ;;  %22 = vst.msk [vmem:[#allocation2 + $0x8] sm:$0xff] %vm20_vm0, %v257_v11  ;;  %s258_s2 = smov [#allocation2]   ;;  %s260_s10 = smov 8  }
   0x6   :  { %57 = vmatpush.bf16.msra.mxu0 %v217_v2  ;;  %s157_s5 = sshll.u32 %s258_s2, 4  ;;  %s158_s5 = int_to_ptr.vmem [resolvable:$true] %s157_s5 }
   0x7   :  { %136 = vmatpush.bf16.msra.mxu1 %v225_v3 }
   0x9   :  { %183 = vmatmul.msk.bf16.vlgmr.msra.gmra.mxu0 %vm20_vm0, %v216_v4 }
   0xb   :  { %137 = vmatpush.bf16.msra.mxu1 %v224_v5  ;;  %v68_v19 = vld [vmem:[#allocation2] sm:$0xff] }
   0xc   :  { %v69_v22 = vld [vmem:[#allocation2 + $0x8] sm:$0xff] }
   0xf   :  { %138 = vmatpush.bf16.msra.mxu1 %v223_v6 }
  0x13   :  { %139 = vmatpush.bf16.msra.mxu1 %v222_v7 }
  0x17   :  { %140 = vmatpush.bf16.msra.mxu1 %v221_v8 }
  0x1b   :  { %141 = vmatpush.bf16.msra.mxu1 %v220_v9 }
  0x1f   :  { %142 = vmatpush.bf16.msra.mxu1 %v219_v10 }
  0x86   :  { %v59_v12 = vpop.f32.mrf.mxu0 }
  0x87   :  { %v64_v13 = vmax.f32 %v59_v12, 0.0 }
  0x89   :  { %v66_v16 = vmul.f32 %v64_v13, %v64_v13 }
  0x8e   :  { %v61_v14 = vpop.f32.mrf.mxu0 }
  0x8f   :  { %v65_v15 = vmax.f32 %v61_v14, 0.0 }
  0x91   :  { %v67_v17 = vmul.f32 %v65_v15, %v65_v15 }
  0x93   :  { %v70_v18 = vpack.c.bf16 %v67_v17, %v66_v16 }
  0x95   :  { %143 = vmatmul.bf16.vlgmr.msra.gmra.mxu1 %v70_v18 }
 0x112   :  { %v144_v20 = vpop.f32.mrf.mxu1 }
 0x113   :  { %v149_v21 = vadd.f32 %v144_v20, %v68_v19 }
 0x115   :  { %151 = vst.msk [vmem:[#allocation2] sm:$0xff] %vm20_vm0, %v149_v21 }
 0x11a   :  { %v146_v23 = vpop.f32.mrf.mxu1 }
 0x11b   :  { %v150_v24 = vadd.f32 %v146_v23, %v69_v22 }
 0x11d   :  { %152 = vst.msk [vmem:[#allocation2 + $0x8] sm:$0xff] %vm20_vm0, %v150_v24 }
 0x11e   :  { %165 = dma.vmem_to_hbm [thread:$0]  %s158_s5, 256, %s160_s8, [#allocation3], %s259_s9, %s259_s9, %s260_s10  }
 0x11f   :  { %255 = dma.done.wait [#allocation3], 256  }
 0x120   :  { %256 = vsyncadd [#allocation3], 4294967040 }
 0x121   :  { %170 = vsyncpa [#allocation3], 1 }

</bundles_post_ra>
